<compile_context>
chip_gen: v5e
topology: v5e:2x2
jax: 0.10.0
libtpu: 0.0.40
codegen_flags: <defaults>
</compile_context>

<pallas_src>
import functools
import math

import jax
import jax.numpy as jnp
from jax.experimental import pallas as pl
from jax.experimental.pallas import tpu as pltpu

_NEG_INF = -1e30                 # finite "minus infinity" for padded item columns
_LOG_CLAMP = math.log(1e-8)      # log of the torch .clamp(min=1e-8)


def _round_up(x, m):
    return ((x + m - 1) // m) * m


def _gen_loss_kernel(nk,
                     uidx_ref,       # (B,) int32 scalar-prefetch (SMEM)
                     user_emb_ref,   # (1, 1, emb_dim)   user row (via uidx[b])
                     item_emb_ref,   # (emb_dim, tile_n) lane-dense item tile
                     bias_ref,       # (1, tile_n)       f32 (padded cols = -1e30)
                     samp_emb_ref,   # (1, S, emb_dim)   pre-gathered sampled rows
                     samp_bias_ref,  # (1, S, 1)         pre-gathered sampled bias
                     reward_ref,     # (1, S, 1)         f32
                     out_ref,        # (1, 1, 1)         f32 per-user loss
                     m_sc, l_sc):    # VMEM (1, 1) f32 running max / sum-exp
    del uidx_ref  # consumed by user_emb_ref's index_map (embedding lookup)
    k = pl.program_id(1)

    @pl.when(k == 0)
    def _():
        m_sc[...] = jnp.full(m_sc.shape, _NEG_INF, dtype=jnp.float32)
        l_sc[...] = jnp.zeros(l_sc.shape, dtype=jnp.float32)

    u = user_emb_ref[0]                                       # (1, emb_dim)

    # Streamed logits for this item tile: (1, emb_dim) @ (emb_dim, tile_n).
    logits = jax.lax.dot_general(
        u, item_emb_ref[...],
        dimension_numbers=(((1,), (0,)), ((), ())),
        preferred_element_type=jnp.float32) + bias_ref[...]   # (1, tile_n) f32

    # Online logsumexp update (flash-softmax style).
    m_prev = m_sc[...]                                        # (1, 1)
    m_new = jnp.maximum(m_prev, jnp.max(logits, axis=-1, keepdims=True))
    l_sc[...] = (l_sc[...] * jnp.exp(m_prev - m_new)
                 + jnp.sum(jnp.exp(logits - m_new), axis=-1, keepdims=True))
    m_sc[...] = m_new

    @pl.when(k == nk - 1)
    def _():
        lse = m_sc[...] + jnp.log(l_sc[...])                  # (1, 1)
        # Sampled logits: tiny (S, emb_dim) * (1, emb_dim) multiply-reduce.
        s_logits = jnp.sum(
            samp_emb_ref[0].astype(jnp.float32) * u.astype(jnp.float32),
            axis=-1, keepdims=True) + samp_bias_ref[0]        # (S, 1)
        # log(clamp(softmax, 1e-8)) == max(logit - logsumexp, log(1e-8))
        log_p = jnp.maximum(s_logits - lse, _LOG_CLAMP)
        loss = -jnp.mean(log_p * reward_ref[0], keepdims=True)  # (1, 1)
        out_ref[...] = loss.reshape(1, 1, 1)


def generator_loss(user_embeddings, item_embeddings, item_bias,
                   user_index, sample, reward,
                   *, tile_n=1024, stream_dtype=jnp.float32, interpret=False):
    """Batched IRGAN generator loss. Returns per-user losses of shape (B,)."""
    user_index = jnp.atleast_1d(jnp.asarray(user_index, jnp.int32))  # (B,)
    B = user_index.shape[0]
    userNum, emb_dim = user_embeddings.shape
    itemNum = item_embeddings.shape[0]

    sample = jnp.asarray(sample, jnp.int32).reshape(B, -1)           # (B, S)
    S = sample.shape[1]
    reward = jnp.asarray(reward, jnp.float32).reshape(B, S, 1)

    # Lane-dense streamed operand: item axis on lanes, tiled & padded.
    tile_n = min(tile_n, _round_up(itemNum, 128))
    itemNum_pad = _round_up(itemNum, tile_n)
    nk = itemNum_pad // tile_n

    item_emb_t = jnp.zeros((emb_dim, itemNum_pad), stream_dtype)
    item_emb_t = item_emb_t.at[:, :itemNum].set(
        item_embeddings.T.astype(stream_dtype))
    bias_pad = jnp.full((1, itemNum_pad), _NEG_INF, jnp.float32)
    bias_pad = bias_pad.at[0, :itemNum].set(item_bias.astype(jnp.float32))

    # Pre-gather the S sampled rows / biases in the wrapper (S is tiny).
    samp_emb = jnp.take(item_embeddings, sample.reshape(-1), axis=0
                        ).reshape(B, S, emb_dim).astype(stream_dtype)
    samp_bias = jnp.take(item_bias, sample.reshape(-1), axis=0
                         ).reshape(B, S, 1).astype(jnp.float32)

    user_emb = user_embeddings.astype(stream_dtype).reshape(userNum, 1, emb_dim)

    kernel = functools.partial(_gen_loss_kernel, nk)

    grid_spec = pltpu.PrefetchScalarGridSpec(
        num_scalar_prefetch=1,          # user_index -> SMEM, drives index_map
        grid=(B, nk),                   # users (parallel) x item tiles (reduce)
        in_specs=[
            pl.BlockSpec((1, 1, emb_dim), lambda b, k, uidx: (uidx[b], 0, 0)),
            pl.BlockSpec((emb_dim, tile_n), lambda b, k, uidx: (0, k)),
            pl.BlockSpec((1, tile_n), lambda b, k, uidx: (0, k)),
            pl.BlockSpec((1, S, emb_dim), lambda b, k, uidx: (b, 0, 0)),
            pl.BlockSpec((1, S, 1), lambda b, k, uidx: (b, 0, 0)),
            pl.BlockSpec((1, S, 1), lambda b, k, uidx: (b, 0, 0)),
        ],
        out_specs=pl.BlockSpec((1, 1, 1), lambda b, k, uidx: (b, 0, 0)),
        scratch_shapes=[pltpu.VMEM((1, 1), jnp.float32),   # running max
                        pltpu.VMEM((1, 1), jnp.float32)],  # running sum-exp
    )

    losses = pl.pallas_call(
        kernel,
        out_shape=jax.ShapeDtypeStruct((B, 1, 1), jnp.float32),
        grid_spec=grid_spec,
        compiler_params=pltpu.CompilerParams(
            dimension_semantics=("parallel", "arbitrary"),
            vmem_limit_bytes=32 * 1024 * 1024),
        interpret=interpret,
    )(user_index, user_emb, item_emb_t, bias_pad, samp_emb, samp_bias, reward)

    return losses.reshape(B)


def generator_forward(user_embeddings, item_embeddings, item_bias,
                      user_index, sample, reward, **kwargs):
    """Pallas equivalent of Generator.forward for a single user (no `conditions`)."""
    losses = generator_loss(
        user_embeddings, item_embeddings, item_bias,
        jnp.asarray(user_index, jnp.int32).reshape(1),
        jnp.asarray(sample).reshape(1, -1),
        jnp.asarray(reward, jnp.float32).reshape(1, -1),
        **kwargs)
    return losses[0]


def _reference_forward(user_embeddings, item_embeddings, item_bias,
                       user_index, sample, reward):
    """Pure-JAX mirror of the PyTorch forward()."""
    u = user_embeddings[user_index]
    logits = jnp.sum(u * item_embeddings, axis=1) + item_bias
    probs = jax.nn.softmax(logits)
    gan_prob = jnp.maximum(probs[sample], 1e-8)
    return -jnp.mean(jnp.log(gan_prob) * reward)


if __name__ == "__main__":
    # Small shapes consistent with Generator(itemNum, userNum, emb_dim, ...).
    itemNum, userNum, emb_dim, num_samples = 300, 16, 32, 8
    initdelta = 0.05

    key = jax.random.PRNGKey(0)
    k1, k2, k3, k4, k5, k6, k7 = jax.random.split(key, 7)

    # __init__ (param == None): uniform(-initdelta, initdelta) embeddings, zero bias.
    user_emb = jax.random.uniform(k1, (userNum, emb_dim), jnp.float32,
                                  -initdelta, initdelta)
    item_emb = jax.random.uniform(k2, (itemNum, emb_dim), jnp.float32,
                                  -initdelta, initdelta)
    item_bias = jax.random.uniform(k3, (itemNum,), jnp.float32, -0.01, 0.01)

    # --- Test 1: single user, small tile (exercises multi-tile online LSE +
    # padding mask: itemNum=300 -> padded to 384, 3 tiles of 128). -------------
    user_index = 3
    sample = jax.random.randint(k4, (num_samples,), 0, itemNum, jnp.int32)
    reward = jax.random.uniform(k5, (num_samples,), jnp.float32)

    loss = jax.block_until_ready(
        generator_forward(user_emb, item_emb, item_bias,
                          user_index, sample, reward, tile_n=128))
    ref = _reference_forward(user_emb, item_emb, item_bias,
                             user_index, sample, reward)
    assert jnp.allclose(loss, ref, atol=1e-5, rtol=1e-5), (loss, ref)

    # --- Test 2: batched users (amortizes the item_embeddings HBM stream). ----
    B = 4
    user_idx_b = jnp.array([3, 0, 7, 12], jnp.int32)
    sample_b = jax.random.randint(k6, (B, num_samples), 0, itemNum, jnp.int32)
    reward_b = jax.random.uniform(k7, (B, num_samples), jnp.float32)

    losses_b = jax.block_until_ready(
        generator_loss(user_emb, item_emb, item_bias,
                       user_idx_b, sample_b, reward_b, tile_n=128))
    ref_b = jnp.stack([
        _reference_forward(user_emb, item_emb, item_bias,
                           int(user_idx_b[i]), sample_b[i], reward_b[i])
        for i in range(B)])
    assert jnp.allclose(losses_b, ref_b, atol=1e-5, rtol=1e-5), (losses_b, ref_b)

    # --- Test 3: bf16-streamed embeddings (f32 accumulation), default tile. ---
    loss_bf16 = jax.block_until_ready(
        generator_forward(user_emb, item_emb, item_bias,
                          user_index, sample, reward,
                          stream_dtype=jnp.bfloat16))
    assert jnp.allclose(loss_bf16, ref, atol=5e-3, rtol=5e-3), (loss_bf16, ref)

    print("KERNEL_OK")
</pallas_src>

<mosaic_0001>
module attributes {stable_mosaic.version = 11 : i64} {
  func.func @_gen_loss_kernel(%arg0: i32, %arg1: i32, %arg2: memref<1xi32, #tpu.memory_space<smem>>, %arg3: memref<1x1x32xf32, #tpu.memory_space<vmem>>, %arg4: memref<32x128xf32, #tpu.memory_space<vmem>>, %arg5: memref<1x128xf32, #tpu.memory_space<vmem>>, %arg6: memref<1x8x32xf32, #tpu.memory_space<vmem>>, %arg7: memref<1x8x1xf32, #tpu.memory_space<vmem>>, %arg8: memref<1x8x1xf32, #tpu.memory_space<vmem>>, %arg9: memref<1x1x1xf32, #tpu.memory_space<vmem>>, %arg10: memref<1x1xf32, #tpu.memory_space<vmem>>, %arg11: memref<1x1xf32, #tpu.memory_space<vmem>>) attributes {dimension_semantics = [#tpu.dimension_semantics<parallel>, #tpu.dimension_semantics<arbitrary>], iteration_bounds = array<i64: 1, 3>, scalar_prefetch = 1 : i64, scratch_operands = 2 : i64, tpu.core_type = #tpu.core_type<tc>, window_params = [{transform_indices = @transform_0, window_bounds = array<i64: 1, 1, 32>}, {transform_indices = @transform_1, window_bounds = array<i64: 32, 128>}, {transform_indices = @transform_2, window_bounds = array<i64: 1, 128>}, {transform_indices = @transform_3, window_bounds = array<i64: 1, 8, 32>}, {transform_indices = @transform_4, window_bounds = array<i64: 1, 8, 1>}, {transform_indices = @transform_5, window_bounds = array<i64: 1, 8, 1>}, {transform_indices = @transform_6, window_bounds = array<i64: 1, 1, 1>}]} {
    %c0_i32 = arith.constant 0 : i32
    %0 = arith.cmpi eq, %arg1, %c0_i32 : i32
    %1 = arith.extui %0 : i1 to i32
    %c0_i32_0 = arith.constant 0 : i32
    %2 = arith.cmpi ne, %1, %c0_i32_0 : i32
    scf.if %2 {
      %cst_18 = arith.constant -1.000000e+30 : f32
      %28 = vector.broadcast %cst_18 : f32 to vector<1x1xf32>
      %c0_19 = arith.constant 0 : index
      %c0_20 = arith.constant 0 : index
      %29 = vector.load %arg10[%c0_19, %c0_20] : memref<1x1xf32, #tpu.memory_space<vmem>>, vector<1x1xf32>
      tpu.vector_store %arg10[%c0_19, %c0_20], %28 {strides = array<i32>} : memref<1x1xf32, #tpu.memory_space<vmem>>, vector<1x1xf32>,
      %cst_21 = arith.constant 0.000000e+00 : f32
      %30 = vector.broadcast %cst_21 : f32 to vector<1x1xf32>
      %c0_22 = arith.constant 0 : index
      %c0_23 = arith.constant 0 : index
      %31 = vector.load %arg11[%c0_22, %c0_23] : memref<1x1xf32, #tpu.memory_space<vmem>>, vector<1x1xf32>
      tpu.vector_store %arg11[%c0_22, %c0_23], %30 {strides = array<i32>} : memref<1x1xf32, #tpu.memory_space<vmem>>, vector<1x1xf32>,
    } else {
    }
    %c0 = arith.constant 0 : index
    %c0_1 = arith.constant 0 : index
    %c0_2 = arith.constant 0 : index
    %3 = vector.load %arg3[%c0, %c0_1, %c0_2] : memref<1x1x32xf32, #tpu.memory_space<vmem>>, vector<1x1x32xf32>
    %4 = vector.shape_cast %3 : vector<1x1x32xf32> to vector<1x32xf32>
    %c0_3 = arith.constant 0 : index
    %c0_4 = arith.constant 0 : index
    %5 = vector.load %arg4[%c0_3, %c0_4] : memref<32x128xf32, #tpu.memory_space<vmem>>, vector<32x128xf32>
    %cst = arith.constant dense<0.000000e+00> : vector<1x128xf32>
    %6 = tpu.matmul %4, %5, %cst {dimension_numbers = #tpu.dot_dimension_numbers<[1], [0], [0], [1], [0, 0, 1, 1], [], []>} : vector<1x32xf32>, vector<32x128xf32>, vector<1x128xf32> -> vector<1x128xf32>
    %c0_5 = arith.constant 0 : index
    %c0_6 = arith.constant 0 : index
    %7 = vector.load %arg5[%c0_5, %c0_6] : memref<1x128xf32, #tpu.memory_space<vmem>>, vector<1x128xf32>
    %8 = arith.addf %6, %7 : vector<1x128xf32>
    %c0_7 = arith.constant 0 : index
    %c0_8 = arith.constant 0 : index
    %9 = vector.load %arg10[%c0_7, %c0_8] : memref<1x1xf32, #tpu.memory_space<vmem>>, vector<1x1xf32>
    %cst_9 = arith.constant dense<0xFF800000> : vector<1xf32>
    %10 = vector.multi_reduction <maximumf>, %8, %cst_9 [1] : vector<1x128xf32> to vector<1xf32>
    %11 = vector.shape_cast %10 : vector<1xf32> to vector<1x1xf32>
    %12 = arith.maximumf %9, %11 : vector<1x1xf32>
    %c0_10 = arith.constant 0 : index
    %c0_11 = arith.constant 0 : index
    %13 = vector.load %arg11[%c0_10, %c0_11] : memref<1x1xf32, #tpu.memory_space<vmem>>, vector<1x1xf32>
    %14 = arith.subf %9, %12 : vector<1x1xf32>
    %15 = math.exp %14 : vector<1x1xf32>
    %16 = arith.mulf %13, %15 : vector<1x1xf32>
    %17 = vector.broadcast %12 : vector<1x1xf32> to vector<1x128xf32>
    %18 = arith.subf %8, %17 : vector<1x128xf32>
    %19 = math.exp %18 : vector<1x128xf32>
    %cst_12 = arith.constant dense<0.000000e+00> : vector<1xf32>
    %20 = vector.multi_reduction <add>, %19, %cst_12 [1] : vector<1x128xf32> to vector<1xf32>
    %21 = vector.shape_cast %20 : vector<1xf32> to vector<1x1xf32>
    %22 = arith.addf %16, %21 : vector<1x1xf32>
    %c0_13 = arith.constant 0 : index
    %c0_14 = arith.constant 0 : index
    %23 = vector.load %arg11[%c0_13, %c0_14] : memref<1x1xf32, #tpu.memory_space<vmem>>, vector<1x1xf32>
    tpu.vector_store %arg11[%c0_13, %c0_14], %22 {strides = array<i32>} : memref<1x1xf32, #tpu.memory_space<vmem>>, vector<1x1xf32>,
    %c0_15 = arith.constant 0 : index
    %c0_16 = arith.constant 0 : index
    %24 = vector.load %arg10[%c0_15, %c0_16] : memref<1x1xf32, #tpu.memory_space<vmem>>, vector<1x1xf32>
    tpu.vector_store %arg10[%c0_15, %c0_16], %12 {strides = array<i32>} : memref<1x1xf32, #tpu.memory_space<vmem>>, vector<1x1xf32>,
    %c2_i32 = arith.constant 2 : i32
    %25 = arith.cmpi eq, %arg1, %c2_i32 : i32
    %26 = arith.extui %25 : i1 to i32
    %c0_i32_17 = arith.constant 0 : i32
    %27 = arith.cmpi ne, %26, %c0_i32_17 : i32
    scf.if %27 {
      %c0_18 = arith.constant 0 : index
      %c0_19 = arith.constant 0 : index
      %28 = vector.load %arg10[%c0_18, %c0_19] : memref<1x1xf32, #tpu.memory_space<vmem>>, vector<1x1xf32>
      %c0_20 = arith.constant 0 : index
      %c0_21 = arith.constant 0 : index
      %29 = vector.load %arg11[%c0_20, %c0_21] : memref<1x1xf32, #tpu.memory_space<vmem>>, vector<1x1xf32>
      %30 = math.log %29 : vector<1x1xf32>
      %31 = arith.addf %28, %30 : vector<1x1xf32>
      %c0_22 = arith.constant 0 : index
      %c0_23 = arith.constant 0 : index
      %c0_24 = arith.constant 0 : index
      %32 = vector.load %arg6[%c0_22, %c0_23, %c0_24] : memref<1x8x32xf32, #tpu.memory_space<vmem>>, vector<1x8x32xf32>
      %33 = vector.shape_cast %32 : vector<1x8x32xf32> to vector<8x32xf32>
      %34 = vector.broadcast %4 : vector<1x32xf32> to vector<8x32xf32>
      %35 = arith.mulf %33, %34 : vector<8x32xf32>
      %cst_25 = arith.constant dense<0.000000e+00> : vector<8xf32>
      %36 = vector.multi_reduction <add>, %35, %cst_25 [1] : vector<8x32xf32> to vector<8xf32>
      %37 = vector.shape_cast %36 : vector<8xf32> to vector<8x1xf32>
      %c0_26 = arith.constant 0 : index
      %c0_27 = arith.constant 0 : index
      %c0_28 = arith.constant 0 : index
      %38 = vector.load %arg7[%c0_26, %c0_27, %c0_28] : memref<1x8x1xf32, #tpu.memory_space<vmem>>, vector<1x8x1xf32>
      %39 = vector.shape_cast %38 : vector<1x8x1xf32> to vector<8x1xf32>
      %40 = arith.addf %37, %39 : vector<8x1xf32>
      %41 = vector.broadcast %31 : vector<1x1xf32> to vector<8x1xf32>
      %42 = arith.subf %40, %41 : vector<8x1xf32>
      %cst_29 = arith.constant -18.420681 : f32
      %43 = vector.broadcast %cst_29 : f32 to vector<8x1xf32>
      %44 = arith.maximumf %42, %43 : vector<8x1xf32>
      %c0_30 = arith.constant 0 : index
      %c0_31 = arith.constant 0 : index
      %c0_32 = arith.constant 0 : index
      %45 = vector.load %arg8[%c0_30, %c0_31, %c0_32] : memref<1x8x1xf32, #tpu.memory_space<vmem>>, vector<1x8x1xf32>
      %46 = vector.shape_cast %45 : vector<1x8x1xf32> to vector<8x1xf32>
      %47 = arith.mulf %44, %46 : vector<8x1xf32>
      %48 = vector.shape_cast %47 : vector<8x1xf32> to vector<1x8x1xf32>
      %cst_33 = arith.constant dense<0.000000e+00> : vector<1xf32>
      %49 = vector.multi_reduction <add>, %48, %cst_33 [1, 2] : vector<1x8x1xf32> to vector<1xf32>
      %50 = vector.shape_cast %49 : vector<1xf32> to vector<1x1x1xf32>
      %51 = vector.extract %50[0, 0, 0] : f32 from vector<1x1x1xf32>
      %52 = vector.broadcast %51 : f32 to vector<1x1xf32>
      %cst_34 = arith.constant 8.000000e+00 : f32
      %53 = vector.broadcast %cst_34 : f32 to vector<1x1xf32>
      %54 = arith.divf %52, %53 : vector<1x1xf32>
      %cst_35 = arith.constant 0.000000e+00 : f32
      %55 = vector.broadcast %cst_35 : f32 to vector<1x1xf32>
      %56 = arith.subf %55, %54 : vector<1x1xf32>
      %57 = vector.shape_cast %56 : vector<1x1xf32> to vector<1x1x1xf32>
      %c0_36 = arith.constant 0 : index
      %c0_37 = arith.constant 0 : index
      %c0_38 = arith.constant 0 : index
      %58 = vector.load %arg9[%c0_36, %c0_37, %c0_38] : memref<1x1x1xf32, #tpu.memory_space<vmem>>, vector<1x1x1xf32>
      tpu.vector_store %arg9[%c0_36, %c0_37, %c0_38], %57 {strides = array<i32>} : memref<1x1x1xf32, #tpu.memory_space<vmem>>, vector<1x1x1xf32>,
    } else {
    }
    return
  }
  func.func @transform_0(%arg0: i32, %arg1: i32, %arg2: memref<1xi32, #tpu.memory_space<smem>>) -> (i32, i32, i32) {
    %0 = arith.index_cast %arg0 : i32 to index
    %1 = memref.load %arg2[%0] : memref<1xi32, #tpu.memory_space<smem>>
    %c0_i32 = arith.constant 0 : i32
    %c0_i32_0 = arith.constant 0 : i32
    %c0_i32_1 = arith.constant 0 : i32
    return %1, %c0_i32, %c0_i32_0 : i32, i32, i32
  }
  func.func @transform_1(%arg0: i32, %arg1: i32, %arg2: memref<1xi32, #tpu.memory_space<smem>>) -> (i32, i32) {
    %c0_i32 = arith.constant 0 : i32
    %c0_i32_0 = arith.constant 0 : i32
    return %c0_i32, %arg1 : i32, i32
  }
  func.func @transform_2(%arg0: i32, %arg1: i32, %arg2: memref<1xi32, #tpu.memory_space<smem>>) -> (i32, i32) {
    %c0_i32 = arith.constant 0 : i32
    %c0_i32_0 = arith.constant 0 : i32
    return %c0_i32, %arg1 : i32, i32
  }
  func.func @transform_3(%arg0: i32, %arg1: i32, %arg2: memref<1xi32, #tpu.memory_space<smem>>) -> (i32, i32, i32) {
    %c0_i32 = arith.constant 0 : i32
    %c0_i32_0 = arith.constant 0 : i32
    %c0_i32_1 = arith.constant 0 : i32
    return %arg0, %c0_i32, %c0_i32_0 : i32, i32, i32
  }
  func.func @transform_4(%arg0: i32, %arg1: i32, %arg2: memref<1xi32, #tpu.memory_space<smem>>) -> (i32, i32, i32) {
    %c0_i32 = arith.constant 0 : i32
    %c0_i32_0 = arith.constant 0 : i32
    %c0_i32_1 = arith.constant 0 : i32
    return %arg0, %c0_i32, %c0_i32_0 : i32, i32, i32
  }
  func.func @transform_5(%arg0: i32, %arg1: i32, %arg2: memref<1xi32, #tpu.memory_space<smem>>) -> (i32, i32, i32) {
    %c0_i32 = arith.constant 0 : i32
    %c0_i32_0 = arith.constant 0 : i32
    %c0_i32_1 = arith.constant 0 : i32
    return %arg0, %c0_i32, %c0_i32_0 : i32, i32, i32
  }
  func.func @transform_6(%arg0: i32, %arg1: i32, %arg2: memref<1xi32, #tpu.memory_space<smem>>) -> (i32, i32, i32) {
    %c0_i32 = arith.constant 0 : i32
    %c0_i32_0 = arith.constant 0 : i32
    %c0_i32_1 = arith.constant 0 : i32
    return %arg0, %c0_i32, %c0_i32_0 : i32, i32, i32
  }
}

</mosaic_0001>

<bundles_post_ra>
// kernel: tpu_custom_call.1
= control target key start
LH: loop header
LB: loop body
LE: loop exit
PB: predicated region body
PF: predicated region fallthrough
CT: control target
= control target key end

     0   :  { %s1142_s0 = inlined_call_operand.<no memory space> [shape: s32[1], index: 0, kind: input, shape index: {}]   ;;  %s1143_s1 = inlined_call_operand.vmem [shape: f32[16,1,32], index: 1, kind: input, shape index: {}]   ;;  %s1144_s2 = inlined_call_operand.hbm [shape: f32[32,384], index: 2, kind: input, shape index: {}]   ;;  %s1145_s3 = inlined_call_operand.hbm [shape: f32[1,384], index: 3, kind: input, shape index: {}]   ;;  %s1146_s4 = inlined_call_operand.hbm [shape: f32[1,8,32], index: 4, kind: input, shape index: {}]   ;;  %s1147_s5 = inlined_call_operand.vmem [shape: f32[1,8,1], index: 5, kind: input, shape index: {}]   ;;  %s1148_s6 = inlined_call_operand.vmem [shape: f32[1,8,1], index: 6, kind: input, shape index: {}]   ;;  %s1149_s7 = inlined_call_operand.hbm [shape: f32[1,1,1], index: 7, kind: output, shape index: {}]  }
   0x1   :  { %1151 = sst [smem:[#allocation18_spill]] %s1146_s4 }
   0x2   :  { %1152 = sst [smem:[#allocation19_spill]] %s1148_s6 }
   0x3   :  { %1153 = sst [smem:[#allocation20_spill]] %s1149_s7 }
   0x4   :  { %12 = sst [smem:[#allocation5]] %s1142_s0 }
   0x5   :  { %13 = vsyncpa [#allocation7], 0 }
   0x6   :  { %15 = vsyncpa [#allocation7 + $0x1], 0 }
   0x7   :  { %16 = vsyncpa [#allocation10], 0 }
   0x8   :  { %18 = vsyncpa [#allocation10 + $0x1], 0 }
   0x9   :  { %19 = vsyncpa [#allocation8], 0  ;;  %s990_s26 = smov 0   ;;  %s992_s27 = smov 0  }
   0xa   :  { %s994_s28 = smov 0   ;;  %s996_s29 = smov 0  }
   0xb   :  { %s998_s30 = smov 0   ;;  %s1000_s8 = smov 0  }
   0xc LB: > { %s1019_s0 = sadd.s32 4294967295, %s936_s8   ;;  %s72_s9 = sadd.s32 1, %s924_s28  ;;  %s936_s8 = sphi %s1000_s8, %s25_s8   ;;  %s932_s30 = sphi %s998_s30, %s1167_s30   ;;  %s928_s29 = sphi %s996_s29, %s1166_s29   ;;  %s924_s28 = sphi %s994_s28, %s1165_s28   ;;  %s920_s27 = sphi %s992_s27, %s1164_s27   ;;  %s916_s26 = sphi %s990_s26, %s1163_s26  }
   0xd   : > { %p79_p0 = scmp.ne.s32.totalorder %s924_s28, %s920_s27  ;;  %p80_p1 = scmp.eq.s32.totalorder %s936_s8, 0 }
   0xe   : > { %p85_p2 = scmp.ne.s32.totalorder %s920_s27, %s916_s26  ;;  %p86_p3 = scmp.eq.s32.totalorder %s1019_s0, 0 }
   0xf   : > { %p1027_p4 = por %p80_p1, %p79_p0  ;;  %p643_p5 = scmp.ge.s32.totalorder %s936_s8, 1 }
  0x10   : > { %p1034_p6 = por %p86_p3, %p85_p2  ;;  %p226_p7 = scmp.lt.s32.totalorder %s936_s8, 4 }
  0x11   : > { %s1156_s4 = sld [smem:[#allocation18_spill]]  ;;  %s938_s16 = smov [#allocation11]  }
  0x12   : > { %p1042_p8 = pnand %p643_p5, %p226_p7  ;;  %s250_s17 = sshll.u32 %s938_s16, 4  ;;  %s251_s17 = int_to_ptr.vmem [resolvable:$true] %s250_s17 }
  0x13   : > { %p686_p10 = scmp.lt.s32.totalorder %s936_s8, 3  ;;  %s34_s19 = sadd.s32 1, %s932_s30 }
  0x14   : > { %p674_p9 = pneg %p1042_p8  ;;  %p35_p13 = scmp.ge.s32.totalorder %s34_s19, 3 }
  0x15   : > { %p1053_p12 = pnand %p686_p10, %p1027_p4  ;;  %s275_s20 = sand.u32 1, %s924_s28  }
  0x16   : > { %p675_p11 = pnand %p674_p9, %p86_p3  ;;  %s649_s21 = sshll.u32 %s932_s30, 3 }
  0x17   : > { %s248_s14 = sshll.u32 %s1156_s4, 4  ;;  %s1169_s19 = smov (%p35_p13, %s34_s19), 0  ;;  %s249_s14 = int_to_ptr.hbm [resolvable:$true] %s248_s14 }
  0x18   : > { %677 = dma.hbm_to_vmem [thread:$0]  (!%p675_p11), %s249_s14, 128, %s251_s17, [#allocation10]  }
  0x19   : > { %1159 = sst [smem:[#allocation17_spill]] %s1169_s19  ;;  %s648_s22 = sshll.u32 %s275_s20, 5 }
  0x1a   : > { %s69_s23 = ssub.s32 %s932_s30, %s1169_s19  ;;  %s283_s26 = scalar_lea.hbm %s1144_s2, %s649_s21 }
  0x1b   : > { %p70_p0 = scmp.eq.s32.totalorder %s69_s23, 0  ;;  %s284_s10 = sshll.u32 %s283_s26, 4  ;;  %s285_s10 = int_to_ptr.hbm [resolvable:$true] %s284_s10 }
  0x1c   : > { %s279_s12 = scalar_lea.vmem [#allocation6], %s648_s22  ;;  %s296_s16 = sand.u32 1, %s936_s8  }
  0x1d   : > { %s286_s13 = sshll.u32 %s279_s12, 4  ;;  %s276_s17 = scalar_lea.sflag [#allocation7], %s275_s20  ;;  %s287_s13 = int_to_ptr.vmem [resolvable:$true] %s286_s13 }
  0x1e   : > { %s1070_s14 = scalar_select %p70_p0, %s924_s28, %s72_s9  }
  0x1f   : > { %s939_s4 = smov 384   ;;  %s940_s7 = smov 128  }
  0x20   : > { %s941_s6 = smov 8   ;;  %s302_s21 = scalar_lea.hbm %s1145_s3, %s932_s30 }
  0x21   : > { %681 = dma.hbm_to_vmem [thread:$0]  (!%p1053_p12), %s285_s10, 512, %s287_s13, %s276_s17, %s939_s4, %s940_s7, %s941_s6  }
  0x22   : > { %s299_s24 = scalar_lea.vmem [#allocation9], %s275_s20  ;;  %s304_s25 = sshll.u32 %s302_s21, 4  ;;  %s305_s25 = int_to_ptr.hbm [resolvable:$true] %s304_s25 }
  0x23   : > { %s306_s22 = sshll.u32 %s299_s24, 4  ;;  %s297_s9 = scalar_lea.sflag [#allocation10], %s296_s16  ;;  %s307_s22 = int_to_ptr.vmem [resolvable:$true] %s306_s22 }
  0x24   : > { %684 = dma.hbm_to_vmem [thread:$0]  (!%p1053_p12), %s305_s25, 16, %s307_s22, %s297_s9  }
  0x25   : > { %315 = sbr.rel (%p1042_p8) target bundleno = 888 (0x378), region = 44  ;;  %s1084_s26 = sand.u32 (!%p1042_p8), 1, %s920_s27  }
  0x26   : > { %s651_s4 = sshll.u32 (!%p1042_p8), %s1084_s26, 5  ;;  %s318_s6 = scalar_lea.sflag (!%p1042_p8), [#allocation7], %s1084_s26 }
  0x27   : > { %s321_s7 = scalar_lea.vmem (!%p1042_p8), [#allocation6], %s651_s4 }
  0x2a   : > { %899 = dma.done.wait (%p1034_p6), %s318_s6, 512  }
  0x2b   : > { %901 = vsyncadd (%p1034_p6), %s318_s6, 4294966784  ;;  %s327_s18 = sand.u32 1, %s1019_s0   ;;  %s330_s19 = scalar_lea.vmem [#allocation9], %s1084_s26 }
  0x2c   : > { %s328_s15 = scalar_lea.sflag [#allocation10], %s327_s18 }
  0x2d   : > { %903 = dma.done.wait (%p1034_p6), %s328_s15, 16  }
  0x2e   : > { %905 = vsyncadd (%p1034_p6), %s328_s15, 4294967280 }
  0x2f   : > { %907 = dma.done.wait (%p86_p3), [#allocation10], 128  }
  0x30   : > { %909 = vsyncadd (%p86_p3), [#allocation10], 4294967168  ;;  %s376_s20 = sld [smem:[#allocation5]]  ;;  %p653_p2 = scmp.ne.s32.totalorder %s928_s29, 0 }
  0x35   : > { %392 = sbr.rel (%p653_p2) target bundleno = 61 (0x3d), region = 60 }
  0x36   : > { %p377_p1 = scmp.lt.s32.totalorder %s376_s20, 15 }
  0x38   : > { %s1171_s20 = smov (!%p377_p1, %s376_s20), 15 }
  0x39   : > { %s379_s13 = scalar_lea.vmem %s1143_s1, %s1171_s20 }
  0x3a   : > { %vm393_vm0 = vcmask 0   ;;  %v942_v0 = vmov -1e+30   ;;  %v943_v1 = vmov 0.0  }
  0x3b   : > { %394 = vst.msk [vmem:[#allocation2] sm:$0x1] %vm393_vm0, %v942_v0 }
  0x3c   : > { %395 = vst.msk [vmem:[#allocation3] sm:$0x1] %vm393_vm0, %v943_v1 }
  0x3d PF: > { %v400_v2 = vld [vmem:[%s321_s7 + $0x18] sm:$0xff]  ;;  %v399_v3 = vld [vmem:[%s321_s7 + $0x10] sm:$0xff]  ;;  %v398_v4 = vld [vmem:[%s321_s7 + $0x8] sm:$0xff]  ;;  %vm402_vm1 = vcmask 261120   ;;  %vm427_vm2 = vcmask 1040384   ;;  %v944_v11 = vmov 0  }
  0x3e   : > { %418 = vmatpush.msra.mxu0 %v400_v2  ;;  %v397_v5 = vld [vmem:[%s321_s7] sm:$0xff]  ;;  %v396_v6 = vld [vmem:[%s379_s13] sm:$0x1]  ;;  %747 = vset.pattern.permute.xlu0 %v944_v11  ;;  %vm450_vm3 = vcmask 0   ;;  %p655_p3 = scmp.ne.s32.totalorder %s928_s29, 2 }
  0x3f   : > { %v401_v7 = vld [vmem:[%s330_s19] sm:$0x1]  ;;  %s1160_s23 = sld [smem:[#allocation19_spill]] (!%p655_p3) }
  0x40   : > { %419 = vmatpush.msra.mxu0 %v399_v3 }
  0x42   : > { %420 = vmatpush.msra.mxu0 %v398_v4  ;;  %v426_v12 = vld [vmem:[#allocation2] sm:$0x1] }
  0x43   : > { %v432_v24 = vld [vmem:[#allocation3] sm:$0x1] }
  0x44   : > { %421 = vmatpush.msra.mxu0 %v397_v5 }
  0x45   : > { %654 = vmatmul.msk.f32.vlgmr.msra.gmra.mxu0 %vm402_vm1, %v396_v6 }
  0xc2   : > { %v423_v8 = vpop.f32.mrf.mxu0 }
  0xc3   : > { %v424_v9 = vadd.f32 %v423_v8, %v401_v7 }
  0xc5   : > { %v428_v10 = vsel %vm427_vm2, %v424_v9, -inf }
  0xc6   : > { %429 = vmax.xlane.f32.xlu0 %v428_v10 }
 0x139   : > { %v430_v13 = vpop.xlane.xlu0 %429 }
 0x13a   : > { %v431_v14 = vmax.f32 %v426_v12, %v430_v13 }
 0x13c   : > { %v433_v15 = vsub.f32 %v426_v12, %v431_v14  ;;  %452 = vst.msk [vmem:[#allocation2] sm:$0x1] %vm450_vm3, %v431_v14  ;;  %439 = vperm.xlu0 %747, %v431_v14  }
 0x13e   : > { %v434_v22 = vmul.f32 1.442695, %v433_v15 }
 0x1ae   : > { %v440_v16 = vpop.permute.xlu0 %439 }
 0x1af   : > { %v442_v17 = vperm.slane %v440_v16, 0 }
 0x1b1   : > { %v443_v18 = vsub.f32 %v424_v9, %v442_v17 }
 0x1b3   : > { %v444_v19 = vmul.f32 1.442695, %v443_v18 }
 0x1b5   : > { %748 = vpow2.f32 %v444_v19 }
 0x1b6   : > { %750 = vpow2.f32 %v434_v22 }
 0x1bb   : > { %v749_v20 = vpop.eup %748 }
 0x1bc   : > { %v446_v21 = vsel %vm427_vm2, %v749_v20, 0.0  ;;  %v751_v23 = vpop.eup %750 }
 0x1bd   : > { %447 = vadd.xlane.f32.xlu1 %v446_v21  ;;  %v436_v25 = vmul.f32 %v751_v23, %v432_v24 }
 0x22f   : > { %456 = sbr.rel (%p655_p3) target bundleno = 878 (0x36e), region = 64 }
 0x230   : > { %v448_v26 = vpop.xlane.xlu1 %447 }
 0x231   : > { %v449_v27 = vadd.f32 %v448_v26, %v436_v25 }
 0x233   : > { %451 = vst.msk [vmem:[#allocation3] sm:$0x1] %vm450_vm3, %v449_v27 }
 0x234   : > { %v462_v28 = vld [vmem:[#allocation11] sm:$0xff]  ;;  %v463_v29 = vperm.slane %v396_v6, 0  ;;  %v457_v35 = vld [vmem:[#allocation2] sm:$0x1]  ;;  %vm478_vm4 = vcmask 7168   ;;  %v945_v53 = vmov 8.0  }
 0x235   : > { %v469_v37 = vld [vmem:[%s1147_s5] sm:$0xff] }
 0x236   : > { %v465_v30 = vmul.f32 %v463_v29, %v462_v28  ;;  %v476_v42 = vld [vmem:[%s1160_s23] sm:$0xff] }
 0x238   : > { %v466_v31 = vsel %vm402_vm1, %v465_v30, 0.0 }
 0x239   : > { %467 = vadd.xlane.f32.xlu0 %v466_v31 }
 0x23a   : > { %v458_v32 = vld [vmem:[#allocation3] sm:$0x1] }
 0x23b   : > { %752 = vlog2.f32 %v458_v32 }
 0x23c   : > { %754 = vrcp.f32 %v945_v53 }
 0x241   : > { %v753_v33 = vpop.eup %752 }
 0x242   : > { %v460_v34 = vmul.f32 0.6931472, %v753_v33  ;;  %v755_v54 = vpop.eup %754 }
 0x243   : > { %v491_v55 = vmul.f32 8.0, %v755_v54  ;;  %vm495_vm5 = vweird.f32 %v755_v54 }
 0x244   : > { %v461_v36 = vadd.f32 %v460_v34, %v457_v35 }
 0x245   : > { %v492_v56 = vsub.f32 1.0, %v491_v55 }
 0x246   : > { %v472_v38 = vperm.slane %v461_v36, 0 }
 0x247   : > { %v493_v57 = vmul.f32 %v755_v54, %v492_v56 }
 0x249   : > { %v494_v58 = vadd.f32 %v755_v54, %v493_v57 }
 0x24b   : > { %v496_v59 = vsel %vm495_vm5, %v755_v54, %v494_v58 }
 0x2ac   : > { %v468_v39 = vpop.xlane.xlu0 %467 }
 0x2ad   : > { %v470_v40 = vadd.f32 %v469_v37, %v468_v39 }
 0x2af   : > { %v474_v41 = vsub.f32 %v470_v40, %v472_v38 }
 0x2b1   : > { %v475_v43 = vmax.f32 %v474_v41, -18.420681 }
 0x2b3   : > { %v477_v44 = vmul.f32 %v476_v42, %v475_v43 }
 0x2b5   : > { %v479_v45 = vsel %vm478_vm4, %v477_v44, 0.0 }
 0x2b6   : > { %480 = vadd.xlane.f32.xlu0 %v479_v45 }
 0x329   : > { %v481_v46 = vpop.xlane.xlu0 %480 }
 0x32a   : > { %v482_v47 = vrot.slane %v481_v46, 4 }
 0x32c   : > { %v483_v48 = vadd.f32 %v482_v47, %v481_v46 }
 0x32e   : > { %v484_v49 = vrot.slane %v483_v48, 2 }
 0x330   : > { %v485_v50 = vadd.f32 %v484_v49, %v483_v48 }
 0x332   : > { %v486_v51 = vrot.slane %v485_v50, 1 }
 0x334   : > { %v487_v52 = vadd.f32 %v486_v51, %v485_v50 }
 0x336   : > { %660 = vpush %v487_v52 }
 0x367   : > { %s661_s21 = spop %660 }
 0x368   : > { %v489_v60 = vstv %s661_s21 }
 0x369   : > { %v497_v61 = vmul.f32 %v496_v59, %v489_v60 }
 0x36b   : > { %v498_v62 = vsub.f32 0.0, %v497_v61 }
 0x36d   : > { %499 = vst.msk [vmem:[#allocation12] sm:$0x1] %vm450_vm3, %v498_v62 }
 0x36e PF: > { %p688_p4 = scmp.eq.s32.totalorder %s1019_s0, 2  ;;  %s1161_s25 = sld [smem:[#allocation20_spill]] }
 0x36f   : > { %s946_s26 = smov [#allocation12]  }
 0x370   : > { %s507_s4 = sshll.u32 %s946_s26, 4  ;;  %s508_s4 = int_to_ptr.vmem [resolvable:$true] %s507_s4 }
 0x374   : > { %s509_s9 = sshll.u32 %s1161_s25, 4  ;;  %s510_s9 = int_to_ptr.hbm [resolvable:$true] %s509_s9 }
 0x375   : > { %671 = dma.vmem_to_hbm [thread:$0]  (%p688_p4), %s508_s4, 16, %s510_s9, [#allocation8]  }
 0x376   : > { %911 = dma.done.wait (%p688_p4), [#allocation8], 16  }
 0x377   : > { %913 = vsyncadd (%p688_p4), [#allocation8], 4294967280 }
 0x378 PF: > { %s25_s8 = sadd.s32 1, %s936_s8   ;;  %s1162_s0 = sld [smem:[#allocation17_spill]] }
 0x379   : > { %p22_p5 = scmp.ge.s32.totalorder %s25_s8, 5   ;;  %s1163_s26 = smov %s920_s27 }
 0x37a   : > { %s1164_s27 = smov %s924_s28  ;;  %s1165_s28 = smov %s1070_s14 }
 0x37b   : > { %s1166_s29 = smov %s932_s30  ;;  %24 = sbr.rel (!%p22_p5) target bundleno = 12 (0xc), region = 117 }
 0x37e   : > { %s1167_s30 = smov %s1162_s0 }
 0x380   :  { %523 = vsyncpa [#allocation7], 1 }
 0x381   :  { %525 = vsyncpa [#allocation7 + $0x1], 1 }
 0x382   :  { %526 = vsyncpa [#allocation10], 1 }
 0x383   :  { %528 = vsyncpa [#allocation10 + $0x1], 1 }
 0x384   :  { %529 = vsyncpa [#allocation8], 1 }
 0x385   :  { %531 = vsyncpa [#allocation8 + $0x1], 1 }

</bundles_post_ra>
